<compile_context>
chip_gen: v6e
topology: v6e:2x2x1
jax: 0.10.0
libtpu: 0.0.40
codegen_flags: <defaults>
</compile_context>

<pallas_src>
import jax
import jax.numpy as jnp
from jax.experimental import pallas as pl
from jax.experimental.pallas import tpu as pltpu


def _outconv_kernel(w_ref, b_ref, x_ref, o_ref):
    # w_ref: (C_out, C_in)  conv weight (kernel_size=1 squeezed)
    # b_ref: (C_out, 1)     bias as a column -> broadcasts over lanes (L)
    # x_ref: (C_in, TL)     one batch's channel-major slab, one L-tile
    # o_ref: (C_out, TL)    lane-dense output tile (L on the lane axis)
    acc = jnp.dot(w_ref[...], x_ref[...], preferred_element_type=jnp.float32)
    o_ref[...] = (acc + b_ref[...]).astype(o_ref.dtype)


def _pick_tile_l(length: int) -> int:
    # Keep L on the lane axis. Either take the full length (block == full dim,
    # which satisfies the (8,128) rule at small L) or a multiple of 128 so
    # partial edge tiles are still legal. Tiles are small (C_in=32 rows of f32),
    # so 1024 lanes double-buffered stays far under the 32 MiB scoped VMEM
    # budget (and well inside v7x's 64 MiB physical VMEM).
    if length <= 1024:
        return length
    for t in (2048, 1024, 512):
        if length % t == 0:
            return t
    return 1024  # multiple of 128; Pallas masks the ragged last tile


def out_conv(x, weight, bias):
    """Conv1d(kernel_size=1) forward in native NCL layout.

    x:      (N, C_in, L)   float32  (PyTorch NCL layout)
    weight: (C_out, C_in)  float32  (PyTorch weight (out_ch, d_model, 1) squeezed)
    bias:   (C_out,)       float32
    returns (N, C_out, L)  float32
    """
    n, c_in, length = x.shape
    c_out = weight.shape[0]

    tile_l = _pick_tile_l(length)
    grid = (n, pl.cdiv(length, tile_l))

    b2d = bias.reshape(c_out, 1)

    return pl.pallas_call(
        _outconv_kernel,
        out_shape=jax.ShapeDtypeStruct((n, c_out, length), x.dtype),
        grid_spec=pltpu.PrefetchScalarGridSpec(
            num_scalar_prefetch=0,
            grid=grid,
            in_specs=[
                # weight / bias: constant index map -> stay resident in VMEM
                pl.BlockSpec((c_out, c_in), lambda b, l: (0, 0)),
                pl.BlockSpec((c_out, 1), lambda b, l: (0, 0)),
                # one batch, one L-tile per grid step; batch dim squeezed away
                pl.BlockSpec((pl.Squeezed(), c_in, tile_l), lambda b, l: (b, 0, l)),
            ],
            out_specs=pl.BlockSpec(
                (pl.Squeezed(), c_out, tile_l), lambda b, l: (b, 0, l)),
        ),
        compiler_params=pltpu.CompilerParams(
            dimension_semantics=("parallel", "parallel"),
            vmem_limit_bytes=32 * 1024 * 1024,
        ),
    )(weight, b2d, x)


if __name__ == "__main__":
    # Small shapes consistent with the module: d_model=32, out_ch=4,
    # input x: (batch=2, d_model=32, length=16)
    d_model, out_ch = 32, 4
    batch, length = 2, 16

    key = jax.random.PRNGKey(0)
    kx, kw, kb = jax.random.split(key, 3)

    x = jax.random.normal(kx, (batch, d_model, length), dtype=jnp.float32)
    # deterministic "PyTorch-like" uniform init for Conv1d(k=1) params
    bound = 1.0 / (d_model ** 0.5)
    weight = jax.random.uniform(kw, (out_ch, d_model), jnp.float32, -bound, bound)
    bias = jax.random.uniform(kb, (out_ch,), jnp.float32, -bound, bound)

    out = out_conv(x, weight, bias)
    jax.block_until_ready(out)

    # sanity check vs plain-JAX reference of conv1d(k=1)
    ref = jnp.einsum("ncl,oc->nol", x, weight) + bias[None, :, None]
    assert out.shape == (batch, out_ch, length)
    assert jnp.allclose(out, ref, atol=1e-5, rtol=1e-5)

    print("KERNEL_OK")
</pallas_src>

<mosaic_0001>
module attributes {stable_mosaic.version = 11 : i64} {
  func.func @_outconv_kernel(%arg0: i32, %arg1: i32, %arg2: memref<4x32xf32, #tpu.memory_space<vmem>>, %arg3: memref<4x1xf32, #tpu.memory_space<vmem>>, %arg4: memref<1x32x16xf32, #tpu.memory_space<vmem>>, %arg5: memref<1x4x16xf32, #tpu.memory_space<vmem>>) attributes {dimension_semantics = [#tpu.dimension_semantics<parallel>, #tpu.dimension_semantics<parallel>], iteration_bounds = array<i64: 2, 1>, scalar_prefetch = 0 : i64, scratch_operands = 0 : i64, tpu.core_type = #tpu.core_type<tc>, window_params = [{pipeline_mode = #tpu.pipeline_mode<synchronous>, transform_indices = @transform_0, window_bounds = array<i64: 4, 32>}, {pipeline_mode = #tpu.pipeline_mode<synchronous>, transform_indices = @transform_1, window_bounds = array<i64: 4, 1>}, {transform_indices = @transform_2, window_bounds = array<i64: 1, 32, 16>}, {transform_indices = @transform_3, window_bounds = array<i64: 1, 4, 16>}]} {
    %c0 = arith.constant 0 : index
    %c0_0 = arith.constant 0 : index
    %0 = vector.load %arg2[%c0, %c0_0] : memref<4x32xf32, #tpu.memory_space<vmem>>, vector<4x32xf32>
    %c0_1 = arith.constant 0 : index
    %c0_2 = arith.constant 0 : index
    %c0_3 = arith.constant 0 : index
    %1 = vector.load %arg4[%c0_1, %c0_2, %c0_3] : memref<1x32x16xf32, #tpu.memory_space<vmem>>, vector<1x32x16xf32>
    %2 = vector.shape_cast %1 : vector<1x32x16xf32> to vector<32x16xf32>
    %cst = arith.constant dense<0.000000e+00> : vector<4x16xf32>
    %3 = tpu.matmul %0, %2, %cst {dimension_numbers = #tpu.dot_dimension_numbers<[1], [0], [0], [1], [0, 0, 1, 1], [], []>} : vector<4x32xf32>, vector<32x16xf32>, vector<4x16xf32> -> vector<4x16xf32>
    %c0_4 = arith.constant 0 : index
    %c0_5 = arith.constant 0 : index
    %4 = vector.load %arg3[%c0_4, %c0_5] : memref<4x1xf32, #tpu.memory_space<vmem>>, vector<4x1xf32>
    %5 = vector.broadcast %4 : vector<4x1xf32> to vector<4x16xf32>
    %6 = arith.addf %3, %5 : vector<4x16xf32>
    %c0_6 = arith.constant 0 : index
    %c0_7 = arith.constant 0 : index
    %c0_8 = arith.constant 0 : index
    %7 = vector.load %arg5[%c0_6, %c0_7, %c0_8] : memref<1x4x16xf32, #tpu.memory_space<vmem>>, vector<1x4x16xf32>
    %8 = vector.shape_cast %7 : vector<1x4x16xf32> to vector<4x16xf32>
    %9 = vector.shape_cast %6 : vector<4x16xf32> to vector<1x4x16xf32>
    tpu.vector_store %arg5[%c0_6, %c0_7, %c0_8], %9 {strides = array<i32>} : memref<1x4x16xf32, #tpu.memory_space<vmem>>, vector<1x4x16xf32>,
    return
  }
  func.func @transform_0(%arg0: i32, %arg1: i32) -> (i32, i32) {
    %c0_i32 = arith.constant 0 : i32
    %c0_i32_0 = arith.constant 0 : i32
    %c0_i32_1 = arith.constant 0 : i32
    return %c0_i32, %c0_i32_0 : i32, i32
  }
  func.func @transform_1(%arg0: i32, %arg1: i32) -> (i32, i32) {
    %c0_i32 = arith.constant 0 : i32
    %c0_i32_0 = arith.constant 0 : i32
    %c0_i32_1 = arith.constant 0 : i32
    return %c0_i32, %c0_i32_0 : i32, i32
  }
  func.func @transform_2(%arg0: i32, %arg1: i32) -> (i32, i32, i32) {
    %c0_i32 = arith.constant 0 : i32
    %c0_i32_0 = arith.constant 0 : i32
    return %arg0, %c0_i32, %arg1 : i32, i32, i32
  }
  func.func @transform_3(%arg0: i32, %arg1: i32) -> (i32, i32, i32) {
    %c0_i32 = arith.constant 0 : i32
    %c0_i32_0 = arith.constant 0 : i32
    return %arg0, %c0_i32, %arg1 : i32, i32, i32
  }
}

</mosaic_0001>

<bundles_post_ra>
// kernel: tpu_custom_call.1
= control target key start
LH: loop header
LB: loop body
LE: loop exit
PB: predicated region body
PF: predicated region fallthrough
CT: control target
= control target key end

     0   :  { %8 = vsyncpa [#allocation3], 0  ;;  %s672_s0 = inlined_call_operand.vmem [shape: f32[4,32], index: 0, kind: input, shape index: {}]   ;;  %s673_s1 = inlined_call_operand.vmem [shape: f32[4,1], index: 1, kind: input, shape index: {}]   ;;  %s674_s2 = inlined_call_operand.vmem [shape: f32[2,32,16], index: 2, kind: input, shape index: {}]   ;;  %s675_s3 = inlined_call_operand.hbm [shape: f32[2,4,16], index: 3, kind: output, shape index: {}]  }
   0x1   :  { %10 = vsyncpa [#allocation3 + $0x1], 0  ;;  %s561_s12 = smov 0   ;;  %s563_s13 = smov 0  }
   0x2   :  { %s565_s14 = smov 0   ;;  %s567_s15 = smov 0  }
   0x3   :  { %s569_s16 = smov 0   ;;  %s571_s17 = smov 0  }
   0x4 LB: > { %s370_s18 = sadd.s32 4294967295, %s535_s17   ;;  %s371_s19 = sadd.s32 4294967294, %s535_s17   ;;  %s535_s17 = sphi %s571_s17, %s16_s17   ;;  %s531_s16 = sphi %s569_s16, %s682_s16   ;;  %s527_s15 = sphi %s567_s15, %s681_s15   ;;  %s523_s14 = sphi %s565_s14, %s680_s14   ;;  %s519_s13 = sphi %s563_s13, %s679_s13   ;;  %s515_s12 = sphi %s561_s12, %s678_s12  }
   0x5   : > { %s28_s20 = sadd.s32 1, %s531_s16  ;;  %s107_s21 = sadd.s32 1, %s523_s14 }
   0x6   : > { %p30_p0 = scmp.ge.s32.totalorder %s28_s20, 2  ;;  %p117_p1 = scmp.ne.s32.totalorder %s523_s14, %s519_s13 }
   0x7   : > { %p118_p2 = scmp.eq.s32.totalorder %s370_s18, 1  ;;  %p123_p3 = scmp.ne.s32.totalorder %s519_s13, %s515_s12 }
   0x8   : > { %s684_s20 = smov (%p30_p0, %s28_s20), 0  ;;  %p124_p5 = scmp.eq.s32.totalorder %s371_s19, 1 }
   0x9   : > { %p601_p4 = por %p118_p2, %p117_p1  ;;  %s102_s23 = ssub.s32 %s531_s16, %s684_s20 }
   0xa   : > { %p374_p6 = scmp.ge.s32.totalorder %s535_s17, 1  ;;  %p105_p7 = scmp.eq.s32.totalorder %s102_s23, 0 }
   0xb   : > { %p608_p8 = por %p124_p5, %p123_p3  ;;  %p159_p9 = scmp.lt.s32.totalorder %s535_s17, 3 }
   0xc   : > { %s614_s25 = scalar_select %p105_p7, %s523_s14, %s107_s21  }
   0xd   : > { %p160_p10 = pnand %p374_p6, %p159_p9 }
   0xe   : > { %p186_p11 = scmp.lt.s32.totalorder (!%p160_p10), %s527_s15, 1  ;;  %s183_s8 = sand.u32 (!%p160_p10), 1, %s519_s13  }
   0xf   : > { %163 = sbr.rel (%p160_p10) target bundleno = 240 (0xf0), region = 32  ;;  %s375_s9 = sshll.u32 (!%p160_p10), %s183_s8, 2 }
  0x10   : > { %s380_s10 = sshll.u32 (!%p160_p10), %s527_s15, 6  ;;  %s185_s11 = scalar_lea.vmem (!%p160_p10), [#allocation2], %s375_s9 }
  0x11   : > { %s296_s18 = sshll.u32 (!%p160_p10), %s185_s11, 4  ;;  %s632_s23 = scalar_lea.hbm (!%p160_p10), %s675_s3, %s380_s10  ;;  %s297_s18 = int_to_ptr.vmem [resolvable:$true] %s296_s18 }
  0x12   : > { %s282_s26 = scalar_lea.sflag (!%p160_p10), [#allocation3], %s183_s8  ;;  %s459_s27 = scalar_lea.vmem (!%p160_p10), %s297_s18, 64 }
  0x13   : > { %p460_p12 = scmp.ne.s32.totalorder (!%p160_p10), %s297_s18, %s459_s27 }
  0x14   : > { %v537_v0 = vmov 0.0   ;;  %vm538_vm0 = vmmov 0   ;;  %v199_v1 = vld [vmem:[%s673_s1] sm:$0xf]  ;;  %s187_s28 = scalar_select %p186_p11, %s527_s15, 1  ;;  %v539_v2 = vmov 0  }
  0x15   : > { %389 = vmatprep.subr.mxu0 %v537_v0  ;;  %397 = vmatprep.mubr.msk.f32.mxu0 %vm538_vm0, %v537_v0  ;;  %v194_v7 = vld [vmem:[%s672_s0] sm:$0xf]  ;;  %vm205_vm1 = vcmask 261120   ;;  %vm279_vm2 = vcmask 125952   ;;  %p461_p13 = pnand %p460_p12, %p601_p4  ;;  %s540_s15 = smov [#allocation2]  }
  0x16   : > { %458 = vset.pattern.permute.xlu0 %v539_v2  ;;  %s383_s29 = sshll.u32 %s187_s28, 5  ;;  %s463_s28 = sshll.u32 %s540_s15, 4  ;;  %s464_s28 = int_to_ptr.vmem [resolvable:$false] %s463_s28 }
  0x17   : > { %202 = vperm.xlu0 %458, %v199_v1   ;;  %s193_s5 = scalar_lea.vmem %s674_s2, %s383_s29  ;;  %p462_p0 = pneg %p461_p13 }
  0x18   : > { %v198_v3 = vld [vmem:[%s193_s5 + $0x18] sm:$0xff]  ;;  %v197_v4 = vld [vmem:[%s193_s5 + $0x10] sm:$0xff]  ;;  %v196_v5 = vld [vmem:[%s193_s5 + $0x8] sm:$0xff]  ;;  %s465_s29 = scalar_lea.vmem %s464_s28, 128  ;;  %p466_p1 = scmp.lt.s32.totalorder %s297_s18, %s464_s28 }
  0x19   : > { %390 = vmatpush3.msra.mxu0 %v198_v3  ;;  %v195_v6 = vld [vmem:[%s193_s5] sm:$0xff]  ;;  %p467_p2 = scmp.lt.s32.totalorder %s465_s29, %s459_s27 }
  0x1a   : > { %391 = vmatprep.subr.mxu0 %v537_v0 }
  0x1b   : > { %392 = vmatpush3.msra.mxu0 %v197_v4  ;;  %p468_p3 = por %p467_p2, %p466_p1 }
  0x1c   : > { %393 = vmatprep.subr.mxu0 %v537_v0 }
  0x1d   : > { %394 = vmatpush3.msra.mxu0 %v196_v5  ;;  %p469_p5 = pnand %p468_p3, %p462_p0 }
  0x1e   : > { %395 = vmatprep.subr.mxu0 %v537_v0 }
  0x1f   : > { %396 = vmatpush3.msra.mxu0 %v195_v6 }
  0x20   : > { %398 = vmatmul.mubr.msk.f32.vlgmr.msra.gmra.mxu0 %vm205_vm1, %v194_v7 }
  0x92   : > { %v203_v8 = vpop.permute.xlu0 %202 }
  0xe0   : > { %v275_v9 = vpop.f32.mrf.mxu0 }
  0xe1   : > { %v276_v10 = vadd.f32 %v275_v9, %v203_v8 }
  0xe2   : > { %v399_v11 = vpop.f32.mrf.mxu0 }
  0xe3   : > { %280 = vst.msk [vmem:[%s185_s11] sm:$0xf] %vm279_vm2, %v276_v10 }
  0xe4   : > { %472 = shalt.err (!%p469_p5)
}
  0xe5   : > { %s473_s30 = scalar_lea.hbm %s632_s23, 64  ;;  %s477_s6 = scalar_lea.hbm %s675_s3, 128 }
  0xe6   : > { %p474_p6 = scmp.ne.s32.totalorder %s632_s23, %s473_s30  ;;  %p478_p10 = scmp.lt.s32.totalorder %s632_s23, %s675_s3 }
  0xe7   : > { %p479_p11 = scmp.lt.s32.totalorder %s477_s6, %s473_s30 }
  0xe8   : > { %p475_p7 = pnand %p474_p6, %p601_p4 }
  0xe9   : > { %p480_p12 = por %p479_p11, %p478_p10 }
  0xea   : > { %p476_p9 = pneg %p475_p7 }
  0xec   : > { %p481_p13 = pnand %p480_p12, %p476_p9 }
  0xee   : > { %484 = shalt.err (!%p481_p13)
}
  0xef   : > { %400 = dma.vmem_to_hbm [thread:$0]  (%p601_p4), %s297_s18, 64, %s632_s23, %s282_s26  }
  0xf0 PF: > { %p406_p0 = scmp.ge.s32.totalorder %s535_s17, 2  ;;  %s308_s9 = sand.u32 1, %s515_s12  }
  0xf1   : > { %s309_s10 = scalar_lea.sflag [#allocation3], %s308_s9 }
  0xf2   : > { %p403_p1 = pnand %p406_p0, %p608_p8 }
  0xf4   : > { %p404_p2 = pneg %p403_p1 }
  0xf6   : > { %510 = dma.done.wait (%p404_p2), %s309_s10, 64  }
  0xf7   : > { %512 = vsyncadd (%p404_p2), %s309_s10, 4294967232  ;;  %s16_s17 = sadd.s32 1, %s535_s17   ;;  %s678_s12 = smov %s519_s13 }
  0xf8   : > { %p13_p3 = scmp.ge.s32.totalorder %s16_s17, 4   ;;  %s679_s13 = smov %s523_s14 }
  0xf9   : > { %s680_s14 = smov %s614_s25  ;;  %s681_s15 = smov %s531_s16 }
  0xfa   : > { %s682_s16 = smov %s684_s20  ;;  %15 = sbr.rel (!%p13_p3) target bundleno = 4 (0x4), region = 67 }
  0xff   :  { %314 = vsyncpa [#allocation3], 1 }
 0x100   :  { %316 = vsyncpa [#allocation3 + $0x1], 1 }

</bundles_post_ra>
